<compile_context>
chip_gen: v6e
topology: v6e:2x2x1
jax: 0.10.0
libtpu: 0.0.40
codegen_flags: <defaults>
</compile_context>

<pallas_src>
import functools
import math

import jax
import jax.numpy as jnp
from jax import lax
from jax.experimental import pallas as pl
from jax.experimental.pallas import tpu as pltpu


_LN_EPS = 1e-5

# Planning budget for VMEM-resident blocks (conservative across v5e/v6e/v7x)
# and the explicit scoped-VMEM limit requested from Mosaic (v7x physical VMEM
# is 64 MiB, so stay well below; raising past the 16/32 MiB defaults is what
# lets row tiles grow toward 512).
_VMEM_PLAN_BYTES = 24 * 1024 * 1024
_VMEM_LIMIT_BYTES = 40 * 1024 * 1024
_FFN_WEIGHT_CHUNK_BYTES = 8 * 1024 * 1024


def _min_row_mult(dtype):
    # Native sublane packing: f32 -> 8, bf16 -> 16, int8/fp8 -> 32.
    return max(8, 32 // jnp.dtype(dtype).itemsize)


def _pick_tile(total, min_mult, per_row_bytes, budget_bytes,
               candidates=(1024, 512, 256, 128, 64, 32, 16, 8)):
    """Largest candidate tile that divides `total`, is a multiple of `min_mult`
    and keeps tile * per_row_bytes under `budget_bytes`.  Falls back to the
    full extent (a single block), which always satisfies the full-dimension
    block-shape rule for tiny/awkward sizes."""
    for cand in candidates:
        if cand % min_mult:
            continue
        if cand <= total and total % cand == 0 and cand * per_row_bytes <= budget_bytes:
            return cand
    return total


# --------------------------------------------------------------------------- #
# Kernels
# --------------------------------------------------------------------------- #
def _qkv_proj_kernel(x_ref, wq_ref, wkv_ref, bq_ref, bkv_ref, q_ref, kv_ref):
    # (tm, D) @ (D, D) and (tm, D) @ (D, 2D); biases added in f32.
    x = x_ref[...]
    q = jnp.dot(x, wq_ref[...], preferred_element_type=jnp.float32) + bq_ref[...]
    kv = jnp.dot(x, wkv_ref[...], preferred_element_type=jnp.float32) + bkv_ref[...]
    q_ref[...] = q.astype(q_ref.dtype)
    kv_ref[...] = kv.astype(kv_ref.dtype)


def _mha_kernel(q_ref, kv_ref, o_ref, m_sc, l_sc, acc_sc, *,
                num_heads, d_head, scale):
    """Flash-style attention over one (batch, q-tile, kv-tile) grid cell.

    q_ref : (1, tq, D)  lane-dense query rows
    kv_ref: (1, tk, 2D) lane-dense [K | V] rows
    o_ref : (1, tq, D)  lane-dense output (written on the last kv step)
    Heads are processed with a static in-kernel loop of 2-D matmuls, so only a
    per-head (tq, tk) f32 score block is live at any time.
    """
    ki = pl.program_id(2)
    d_model = num_heads * d_head

    @pl.when(ki == 0)
    def _():
        m_sc[...] = jnp.full_like(m_sc, -jnp.inf)
        l_sc[...] = jnp.zeros_like(l_sc)
        acc_sc[...] = jnp.zeros_like(acc_sc)

    q = q_ref[0]      # (tq, D)
    kv = kv_ref[0]    # (tk, 2D)

    # TODO(synk): optional attention-mask path not implemented (forward uses
    #             mask=None); attention-weight dropout skipped (eval mode).
    for h in range(num_heads):
        lo, hi = h * d_head, (h + 1) * d_head
        qh = q[:, lo:hi]                               # (tq, dk)
        kh = kv[:, lo:hi]                              # (tk, dk)
        vh = kv[:, d_model + lo:d_model + hi]          # (tk, dk)

        s = lax.dot_general(qh, kh, (((1,), (1,)), ((), ())),
                            preferred_element_type=jnp.float32) * scale  # (tq, tk)

        m_prev = m_sc[h]                               # (tq, 1)
        m_new = jnp.maximum(m_prev, jnp.max(s, axis=-1, keepdims=True))
        alpha = jnp.exp(m_prev - m_new)
        p = jnp.exp(s - m_new)

        l_sc[h] = alpha * l_sc[h] + jnp.sum(p, axis=-1, keepdims=True)
        acc_sc[h] = alpha * acc_sc[h] + jnp.dot(
            p.astype(vh.dtype), vh, preferred_element_type=jnp.float32)
        m_sc[h] = m_new

    @pl.when(ki == pl.num_programs(2) - 1)
    def _():
        # Deferred softmax normalization (one divide per output element).
        outs = [acc_sc[h] * pl.reciprocal(l_sc[h], approx=False)
                for h in range(num_heads)]
        o_ref[0] = jnp.concatenate(outs, axis=-1).astype(o_ref.dtype)


def _layernorm_f32(r, g, b, eps):
    mean = jnp.mean(r, axis=-1, keepdims=True)
    var = jnp.mean(jnp.square(r - mean), axis=-1, keepdims=True)
    return (r - mean) * lax.rsqrt(var + eps) * g + b


def _out_proj_residual_ln_kernel(attn_ref, x_ref, wo_ref, bo_ref, g_ref, b_ref,
                                 o_ref, *, eps):
    proj = jnp.dot(attn_ref[...], wo_ref[...],
                   preferred_element_type=jnp.float32) + bo_ref[...]
    # TODO(synk): dropout after attention output skipped (eval mode -> identity).
    r = x_ref[...].astype(jnp.float32) + proj
    o_ref[...] = _layernorm_f32(r, g_ref[...], b_ref[...], eps).astype(o_ref.dtype)


def _ffn_residual_ln_kernel(x_ref, w1_ref, b1_ref, w2_ref, b2_ref, g_ref, b_ref,
                            o_ref, acc_ref, *, eps):
    # Grid: (row tiles [parallel], d_ff chunks [arbitrary]).
    c = pl.program_id(1)

    @pl.when(c == 0)
    def _():
        acc_ref[...] = jnp.zeros_like(acc_ref)

    h = jnp.dot(x_ref[...], w1_ref[...],
                preferred_element_type=jnp.float32) + b1_ref[...]
    h = jnp.maximum(h, 0.0)
    acc_ref[...] += jnp.dot(h.astype(w2_ref.dtype), w2_ref[...],
                            preferred_element_type=jnp.float32)

    @pl.when(c == pl.num_programs(1) - 1)
    def _():
        # TODO(synk): dropout after FFN output skipped (eval mode -> identity).
        r = x_ref[...].astype(jnp.float32) + acc_ref[...] + b2_ref[...]
        o_ref[...] = _layernorm_f32(r, g_ref[...], b_ref[...], eps).astype(o_ref.dtype)


# --------------------------------------------------------------------------- #
# Wrapper
# --------------------------------------------------------------------------- #
def transformer_block_forward(x, params, num_heads):
    """x: (B, S, D). params: dict of weights (see init_transformer_block_params)."""
    b, s, d = x.shape
    assert d % num_heads == 0
    dk = d // num_heads
    m = b * s
    dt = x.dtype
    itemsize = jnp.dtype(dt).itemsize
    d_ff = params["w1"].shape[1]
    min_mult = _min_row_mult(dt)

    x2d = x.reshape(m, d)  # lane-dense (M, D) activation slab

    # Weights in the MXU input (activation) dtype; biases / LN params stay f32
    # and are applied inside the f32 accumulators (precision parity with ref).
    wqkv = params["wqkv"].astype(dt)
    wq, wkv = wqkv[:, :d], wqkv[:, d:]
    bqkv = params["bqkv"].astype(jnp.float32)
    bq, bkv = bqkv[:d].reshape(1, d), bqkv[d:].reshape(1, 2 * d)
    wo = params["wo"].astype(dt)
    bo = params["bo"].astype(jnp.float32).reshape(1, d)
    w1 = params["w1"].astype(dt)
    b1 = params["b1"].astype(jnp.float32).reshape(1, d_ff)
    w2 = params["w2"].astype(dt)
    b2 = params["b2"].astype(jnp.float32).reshape(1, d)
    g1 = params["ln1_g"].astype(jnp.float32).reshape(1, d)
    bt1 = params["ln1_b"].astype(jnp.float32).reshape(1, d)
    g2 = params["ln2_g"].astype(jnp.float32).reshape(1, d)
    bt2 = params["ln2_b"].astype(jnp.float32).reshape(1, d)

    cp_row = pltpu.CompilerParams(dimension_semantics=("parallel",),
                                  vmem_limit_bytes=_VMEM_LIMIT_BYTES)

    # ---- 1) QKV projection -> lane-dense q (M, D) and kv (M, 2D) slabs ------
    w_res1 = 3 * d * d * itemsize * 2                 # wq + wkv, double-buffered
    per_row1 = 4 * d * itemsize * 2                   # x in + q out + kv out
    t1 = _pick_tile(m, min_mult, per_row1, max(_VMEM_PLAN_BYTES - w_res1, 2 << 20))
    q2d, kv2d = pl.pallas_call(
        _qkv_proj_kernel,
        out_shape=(jax.ShapeDtypeStruct((m, d), dt),
                   jax.ShapeDtypeStruct((m, 2 * d), dt)),
        grid=(m // t1,),
        in_specs=[
            pl.BlockSpec((t1, d), lambda i: (i, 0)),
            pl.BlockSpec((d, d), lambda i: (0, 0)),
            pl.BlockSpec((d, 2 * d), lambda i: (0, 0)),
            pl.BlockSpec((1, d), lambda i: (0, 0)),
            pl.BlockSpec((1, 2 * d), lambda i: (0, 0)),
        ],
        out_specs=(pl.BlockSpec((t1, d), lambda i: (i, 0)),
                   pl.BlockSpec((t1, 2 * d), lambda i: (i, 0))),
        compiler_params=cp_row,
    )(x2d, wq, wkv, bq, bkv)

    # ---- 2) multi-head attention: grid (B, q-tiles, kv-tiles), flash-style --
    q3 = q2d.reshape(b, s, d)          # free reshapes (contiguous)
    kv3 = kv2d.reshape(b, s, 2 * d)

    scr_row = num_heads * (2 * 128 + dk) * 4            # m, l (lane-padded), acc per q row
    per_qrow = 2 * d * itemsize * 2 + scr_row            # q in + o out (double-buffered) + scratch
    per_kvrow = 2 * d * itemsize * 2                      # kv in (double-buffered)
    tq = _pick_tile(s, min_mult, per_qrow, _VMEM_PLAN_BYTES // 2,
                    candidates=(256, 128, 64, 32, 16, 8))
    tk = _pick_tile(s, min_mult, per_kvrow, _VMEM_PLAN_BYTES // 2,
                    candidates=(512, 256, 128, 64, 32, 16, 8))

    scale = 1.0 / math.sqrt(dk)
    attn = pl.pallas_call(
        functools.partial(_mha_kernel, num_heads=num_heads, d_head=dk, scale=scale),
        out_shape=jax.ShapeDtypeStruct((b, s, d), dt),
        grid=(b, s // tq, s // tk),
        in_specs=[
            pl.BlockSpec((1, tq, d), lambda bb, qi, ki: (bb, qi, 0)),
            pl.BlockSpec((1, tk, 2 * d), lambda bb, qi, ki: (bb, ki, 0)),
        ],
        out_specs=pl.BlockSpec((1, tq, d), lambda bb, qi, ki: (bb, qi, 0)),
        scratch_shapes=[
            pltpu.VMEM((num_heads, tq, 1), jnp.float32),   # running max
            pltpu.VMEM((num_heads, tq, 1), jnp.float32),   # running denom
            pltpu.VMEM((num_heads, tq, dk), jnp.float32),  # running numerator
        ],
        compiler_params=pltpu.CompilerParams(
            dimension_semantics=("parallel", "parallel", "arbitrary"),
            vmem_limit_bytes=_VMEM_LIMIT_BYTES),
    )(q3, kv3)
    attn2d = attn.reshape(m, d)        # already lane-dense: no transpose needed

    # ---- 3) out-proj + residual + LayerNorm1 (fused) ------------------------
    w_res3 = d * d * itemsize * 2
    per_row3 = 3 * d * itemsize * 2                      # attn in + x in + out
    t3 = _pick_tile(m, min_mult, per_row3, max(_VMEM_PLAN_BYTES - w_res3, 2 << 20))
    x1 = pl.pallas_call(
        functools.partial(_out_proj_residual_ln_kernel, eps=_LN_EPS),
        out_shape=jax.ShapeDtypeStruct((m, d), dt),
        grid=(m // t3,),
        in_specs=[
            pl.BlockSpec((t3, d), lambda i: (i, 0)),     # attention output
            pl.BlockSpec((t3, d), lambda i: (i, 0)),     # residual x
            pl.BlockSpec((d, d), lambda i: (0, 0)),
            pl.BlockSpec((1, d), lambda i: (0, 0)),
            pl.BlockSpec((1, d), lambda i: (0, 0)),
            pl.BlockSpec((1, d), lambda i: (0, 0)),
        ],
        out_specs=pl.BlockSpec((t3, d), lambda i: (i, 0)),
        compiler_params=cp_row,
    )(attn2d, x2d, wo, bo, g1, bt1)

    # ---- 4) FFN (d_ff chunked) + residual + LayerNorm2 (fused) --------------
    # d_ff chunk: largest multiple-of-128 divisor whose double-buffered
    # w1/w2 slices stay under the per-chunk weight budget (full d_ff if small).
    t_dff = d_ff
    if 2 * (d * d_ff * itemsize) * 2 > _FFN_WEIGHT_CHUNK_BYTES:
        for cand in (4096, 2048, 1024, 512, 256, 128):
            if d_ff % cand == 0 and 2 * (d * cand * itemsize) * 2 <= _FFN_WEIGHT_CHUNK_BYTES:
                t_dff = cand
                break

    w_res4 = 2 * d * t_dff * itemsize * 2
    per_row4 = 2 * d * itemsize * 2 + d * 4 + t_dff * 4  # x,out blocks + f32 acc + live hidden
    t4 = _pick_tile(m, min_mult, per_row4, max(_VMEM_PLAN_BYTES - w_res4, 2 << 20))
    y = pl.pallas_call(
        functools.partial(_ffn_residual_ln_kernel, eps=_LN_EPS),
        out_shape=jax.ShapeDtypeStruct((m, d), dt),
        grid=(m // t4, d_ff // t_dff),
        in_specs=[
            pl.BlockSpec((t4, d), lambda i, c: (i, 0)),
            pl.BlockSpec((d, t_dff), lambda i, c: (0, c)),
            pl.BlockSpec((1, t_dff), lambda i, c: (0, c)),
            pl.BlockSpec((t_dff, d), lambda i, c: (c, 0)),
            pl.BlockSpec((1, d), lambda i, c: (0, 0)),
            pl.BlockSpec((1, d), lambda i, c: (0, 0)),
            pl.BlockSpec((1, d), lambda i, c: (0, 0)),
        ],
        out_specs=pl.BlockSpec((t4, d), lambda i, c: (i, 0)),
        scratch_shapes=[pltpu.VMEM((t4, d), jnp.float32)],
        compiler_params=pltpu.CompilerParams(
            dimension_semantics=("parallel", "arbitrary"),
            vmem_limit_bytes=_VMEM_LIMIT_BYTES),
    )(x1, w1, b1, w2, b2, g2, bt2)

    return y.reshape(b, s, d)


# --------------------------------------------------------------------------- #
# Parameter init + pure-JAX reference
# --------------------------------------------------------------------------- #
def init_transformer_block_params(key, d_model, num_heads, d_ff, dtype=jnp.float32):
    ks = jax.random.split(key, 12)
    si = 1.0 / math.sqrt(d_model)
    sf = 1.0 / math.sqrt(d_ff)
    return {
        "wqkv": jax.random.uniform(ks[0], (d_model, 3 * d_model), dtype, -si, si),
        "bqkv": jax.random.uniform(ks[1], (3 * d_model,), dtype, -si, si),
        "wo": jax.random.uniform(ks[2], (d_model, d_model), dtype, -si, si),
        "bo": jax.random.uniform(ks[3], (d_model,), dtype, -si, si),
        "w1": jax.random.uniform(ks[4], (d_model, d_ff), dtype, -si, si),
        "b1": jax.random.uniform(ks[5], (d_ff,), dtype, -si, si),
        "w2": jax.random.uniform(ks[6], (d_ff, d_model), dtype, -sf, sf),
        "b2": jax.random.uniform(ks[7], (d_model,), dtype, -sf, sf),
        "ln1_g": 1.0 + 0.1 * jax.random.normal(ks[8], (d_model,), dtype),
        "ln1_b": 0.1 * jax.random.normal(ks[9], (d_model,), dtype),
        "ln2_g": 1.0 + 0.1 * jax.random.normal(ks[10], (d_model,), dtype),
        "ln2_b": 0.1 * jax.random.normal(ks[11], (d_model,), dtype),
    }


def _reference_forward(x, p, num_heads):
    b, s, d = x.shape
    dk = d // num_heads
    x2d = x.reshape(b * s, d)
    qkv = x2d @ p["wqkv"] + p["bqkv"]
    q, k, v = jnp.split(qkv, 3, axis=-1)

    def heads(t):
        return t.reshape(b, s, num_heads, dk).transpose(0, 2, 1, 3)

    q, k, v = heads(q), heads(k), heads(v)
    sc = jnp.einsum("bhqd,bhkd->bhqk", q, k) / math.sqrt(dk)
    pr = jax.nn.softmax(sc, axis=-1)
    o = jnp.einsum("bhqk,bhkd->bhqd", pr, v).transpose(0, 2, 1, 3).reshape(b * s, d)
    attn = o @ p["wo"] + p["bo"]

    def ln(t, g, be):
        mu = t.mean(-1, keepdims=True)
        var = ((t - mu) ** 2).mean(-1, keepdims=True)
        return (t - mu) / jnp.sqrt(var + _LN_EPS) * g + be

    x1 = ln(x2d + attn, p["ln1_g"], p["ln1_b"])
    h = jnp.maximum(x1 @ p["w1"] + p["b1"], 0.0)
    ff = h @ p["w2"] + p["b2"]
    x2 = ln(x1 + ff, p["ln2_g"], p["ln2_b"])
    return x2.reshape(b, s, d)


if __name__ == "__main__":
    # Small shapes consistent with the module: batch=2, seq=8, dModel=32,
    # numHeads=4, dFf=64.
    B, S, D, H, DFF = 2, 8, 32, 4, 64

    key = jax.random.PRNGKey(0)
    kx, kp = jax.random.split(key)
    x = jax.random.normal(kx, (B, S, D), dtype=jnp.float32)
    params = init_transformer_block_params(kp, D, H, DFF)

    out = transformer_block_forward(x, params, H)
    out = jax.block_until_ready(out)

    ref = _reference_forward(x, params, H)
    assert out.shape == (B, S, D)
    assert jnp.allclose(out, ref, atol=2e-4, rtol=2e-4), "mismatch vs reference"

    print("KERNEL_OK")
</pallas_src>

<mosaic_0001>
module attributes {stable_mosaic.version = 11 : i64} {
  func.func @_qkv_proj_kernel(%arg0: i32, %arg1: memref<16x32xf32, #tpu.memory_space<vmem>>, %arg2: memref<32x32xf32, #tpu.memory_space<vmem>>, %arg3: memref<32x64xf32, #tpu.memory_space<vmem>>, %arg4: memref<1x32xf32, #tpu.memory_space<vmem>>, %arg5: memref<1x64xf32, #tpu.memory_space<vmem>>, %arg6: memref<16x32xf32, #tpu.memory_space<vmem>>, %arg7: memref<16x64xf32, #tpu.memory_space<vmem>>) attributes {dimension_semantics = [#tpu.dimension_semantics<parallel>], iteration_bounds = array<i64: 1>, scalar_prefetch = 0 : i64, scratch_operands = 0 : i64, tpu.core_type = #tpu.core_type<tc>, window_params = [{transform_indices = @transform_0, window_bounds = array<i64: 16, 32>}, {pipeline_mode = #tpu.pipeline_mode<synchronous>, transform_indices = @transform_1, window_bounds = array<i64: 32, 32>}, {pipeline_mode = #tpu.pipeline_mode<synchronous>, transform_indices = @transform_2, window_bounds = array<i64: 32, 64>}, {pipeline_mode = #tpu.pipeline_mode<synchronous>, transform_indices = @transform_3, window_bounds = array<i64: 1, 32>}, {pipeline_mode = #tpu.pipeline_mode<synchronous>, transform_indices = @transform_4, window_bounds = array<i64: 1, 64>}, {transform_indices = @transform_5, window_bounds = array<i64: 16, 32>}, {transform_indices = @transform_6, window_bounds = array<i64: 16, 64>}]} {
    %c0 = arith.constant 0 : index
    %c0_0 = arith.constant 0 : index
    %0 = vector.load %arg1[%c0, %c0_0] : memref<16x32xf32, #tpu.memory_space<vmem>>, vector<16x32xf32>
    %c0_1 = arith.constant 0 : index
    %c0_2 = arith.constant 0 : index
    %1 = vector.load %arg2[%c0_1, %c0_2] : memref<32x32xf32, #tpu.memory_space<vmem>>, vector<32x32xf32>
    %cst = arith.constant dense<0.000000e+00> : vector<16x32xf32>
    %2 = tpu.matmul %0, %1, %cst {dimension_numbers = #tpu.dot_dimension_numbers<[1], [0], [0], [1], [0, 0, 1, 1], [], []>} : vector<16x32xf32>, vector<32x32xf32>, vector<16x32xf32> -> vector<16x32xf32>
    %c0_3 = arith.constant 0 : index
    %c0_4 = arith.constant 0 : index
    %3 = vector.load %arg4[%c0_3, %c0_4] : memref<1x32xf32, #tpu.memory_space<vmem>>, vector<1x32xf32>
    %4 = vector.broadcast %3 : vector<1x32xf32> to vector<16x32xf32>
    %5 = arith.addf %2, %4 : vector<16x32xf32>
    %c0_5 = arith.constant 0 : index
    %c0_6 = arith.constant 0 : index
    %6 = vector.load %arg3[%c0_5, %c0_6] : memref<32x64xf32, #tpu.memory_space<vmem>>, vector<32x64xf32>
    %cst_7 = arith.constant dense<0.000000e+00> : vector<16x64xf32>
    %7 = tpu.matmul %0, %6, %cst_7 {dimension_numbers = #tpu.dot_dimension_numbers<[1], [0], [0], [1], [0, 0, 1, 1], [], []>} : vector<16x32xf32>, vector<32x64xf32>, vector<16x64xf32> -> vector<16x64xf32>
    %c0_8 = arith.constant 0 : index
    %c0_9 = arith.constant 0 : index
    %8 = vector.load %arg5[%c0_8, %c0_9] : memref<1x64xf32, #tpu.memory_space<vmem>>, vector<1x64xf32>
    %9 = vector.broadcast %8 : vector<1x64xf32> to vector<16x64xf32>
    %10 = arith.addf %7, %9 : vector<16x64xf32>
    %c0_10 = arith.constant 0 : index
    %c0_11 = arith.constant 0 : index
    %11 = vector.load %arg6[%c0_10, %c0_11] : memref<16x32xf32, #tpu.memory_space<vmem>>, vector<16x32xf32>
    tpu.vector_store %arg6[%c0_10, %c0_11], %5 {strides = array<i32>} : memref<16x32xf32, #tpu.memory_space<vmem>>, vector<16x32xf32>,
    %c0_12 = arith.constant 0 : index
    %c0_13 = arith.constant 0 : index
    %12 = vector.load %arg7[%c0_12, %c0_13] : memref<16x64xf32, #tpu.memory_space<vmem>>, vector<16x64xf32>
    tpu.vector_store %arg7[%c0_12, %c0_13], %10 {strides = array<i32>} : memref<16x64xf32, #tpu.memory_space<vmem>>, vector<16x64xf32>,
    return
  }
  func.func @transform_0(%arg0: i32) -> (i32, i32) {
    %c0_i32 = arith.constant 0 : i32
    %c0_i32_0 = arith.constant 0 : i32
    return %arg0, %c0_i32 : i32, i32
  }
  func.func @transform_1(%arg0: i32) -> (i32, i32) {
    %c0_i32 = arith.constant 0 : i32
    %c0_i32_0 = arith.constant 0 : i32
    %c0_i32_1 = arith.constant 0 : i32
    return %c0_i32, %c0_i32_0 : i32, i32
  }
  func.func @transform_2(%arg0: i32) -> (i32, i32) {
    %c0_i32 = arith.constant 0 : i32
    %c0_i32_0 = arith.constant 0 : i32
    %c0_i32_1 = arith.constant 0 : i32
    return %c0_i32, %c0_i32_0 : i32, i32
  }
  func.func @transform_3(%arg0: i32) -> (i32, i32) {
    %c0_i32 = arith.constant 0 : i32
    %c0_i32_0 = arith.constant 0 : i32
    %c0_i32_1 = arith.constant 0 : i32
    return %c0_i32, %c0_i32_0 : i32, i32
  }
  func.func @transform_4(%arg0: i32) -> (i32, i32) {
    %c0_i32 = arith.constant 0 : i32
    %c0_i32_0 = arith.constant 0 : i32
    %c0_i32_1 = arith.constant 0 : i32
    return %c0_i32, %c0_i32_0 : i32, i32
  }
  func.func @transform_5(%arg0: i32) -> (i32, i32) {
    %c0_i32 = arith.constant 0 : i32
    %c0_i32_0 = arith.constant 0 : i32
    return %arg0, %c0_i32 : i32, i32
  }
  func.func @transform_6(%arg0: i32) -> (i32, i32) {
    %c0_i32 = arith.constant 0 : i32
    %c0_i32_0 = arith.constant 0 : i32
    return %arg0, %c0_i32 : i32, i32
  }
}

</mosaic_0001>

<bundles_post_ra>
// kernel: tpu_custom_call.1
= control target key start
LH: loop header
LB: loop body
LE: loop exit
PB: predicated region body
PF: predicated region fallthrough
CT: control target
= control target key end

     0   :  { %12 = vsyncpa [#allocation3], 0  ;;  %s524_s0 = inlined_call_operand.hbm [shape: f32[16,32], index: 0, kind: input, shape index: {}]   ;;  %s525_s1 = inlined_call_operand.hbm [shape: f32[32,32], index: 1, kind: input, shape index: {}]   ;;  %s526_s2 = inlined_call_operand.hbm [shape: f32[32,64], index: 2, kind: input, shape index: {}]   ;;  %s527_s3 = inlined_call_operand.vmem [shape: f32[1,32], index: 3, kind: input, shape index: {}]   ;;  %s528_s4 = inlined_call_operand.vmem [shape: f32[1,64], index: 4, kind: input, shape index: {}]   ;;  %s529_s5 = inlined_call_operand.hbm [shape: f32[16,32], index: 5, kind: output, shape index: {0}]   ;;  %s530_s6 = inlined_call_operand.hbm [shape: f32[16,64], index: 6, kind: output, shape index: {1}]  }
   0x1   :  { %13 = vsyncpa [#allocation6], 0 }
   0x2   :  { %14 = vsyncpa [#allocation4], 0 }
   0x3   :  { %15 = vsyncpa [#allocation10], 0  ;;  %s440_s21 = smov [#allocation5]   ;;  %s441_s23 = smov [#allocation2]  }
   0x4   :  { %s33_s22 = sshll.u32 %s440_s21, 4  ;;  %s21_s24 = sshll.u32 %s441_s23, 4  ;;  %s34_s22 = int_to_ptr.vmem [resolvable:$true] %s33_s22  ;;  %s22_s24 = int_to_ptr.vmem [resolvable:$true] %s21_s24 }
   0x5   :  { %s340_s25 = scalar_lea.vmem %s34_s22, 512  ;;  %p345_p1 = scmp.lt.s32.totalorder %s34_s22, %s34_s22 }
   0x6   :  { %p341_p0 = scmp.ne.s32.totalorder %s34_s22, %s340_s25  ;;  %p346_p2 = scmp.lt.s32.totalorder %s340_s25, %s340_s25 }
   0x8   :  { %p347_p3 = por %p346_p2, %p345_p1 }
   0xa   :  { %p348_p4 = pnand %p347_p3, %p341_p0 }
   0xc   :  { %351 = shalt.err (!%p348_p4)
}
   0xd   :  { %s442_s26 = smov 128   ;;  %s443_s27 = smov 8  }
   0xe   :  { %39 = dma.hbm_to_vmem [thread:$0]  %s525_s1, 512, %s34_s22, [#allocation6], %s442_s26, %s442_s26, %s443_s27  }
   0xf   :  { %s360_s30 = scalar_lea.vmem %s22_s24, 256  ;;  %p365_p6 = scmp.lt.s32.totalorder %s22_s24, %s22_s24 }
  0x10   :  { %p361_p5 = scmp.ne.s32.totalorder %s22_s24, %s360_s30  ;;  %p366_p7 = scmp.lt.s32.totalorder %s360_s30, %s360_s30 }
  0x12   :  { %p367_p8 = por %p366_p7, %p365_p6 }
  0x14   :  { %p368_p9 = pnand %p367_p8, %p361_p5 }
  0x16   :  { %371 = shalt.err (!%p368_p9)
}
  0x17   :  { %27 = dma.hbm_to_vmem [thread:$0]  %s524_s0, 256, %s22_s24, [#allocation3], %s442_s26, %s442_s26, %s443_s27  }
  0x18   :  { %s444_s9 = smov [#allocation7]  }
  0x19   :  { %s45_s10 = sshll.u32 %s444_s9, 4  ;;  %s46_s10 = int_to_ptr.vmem [resolvable:$true] %s45_s10 }
  0x1a   :  { %s380_s11 = scalar_lea.vmem %s46_s10, 512  ;;  %p385_p11 = scmp.lt.s32.totalorder %s46_s10, %s46_s10 }
  0x1b   :  { %p381_p10 = scmp.ne.s32.totalorder %s46_s10, %s380_s11  ;;  %p386_p12 = scmp.lt.s32.totalorder %s380_s11, %s380_s11 }
  0x1d   :  { %p387_p13 = por %p386_p12, %p385_p11 }
  0x1f   :  { %p388_p0 = pnand %p387_p13, %p381_p10 }
  0x21   :  { %391 = shalt.err (!%p388_p0)
}
  0x22   :  { %51 = dma.hbm_to_vmem [thread:$0]  %s526_s2, 512, %s46_s10, [#allocation6], %s442_s26, %s442_s26, %s443_s27  }
  0x23   :  { %432 = dma.done.wait [#allocation3], 256  }
  0x24   :  { %433 = vsyncadd [#allocation3], 4294967040 }
  0x25   :  { %434 = dma.done.wait [#allocation6], 1024  }
  0x26   :  { %435 = vsyncadd [#allocation6], 4294966272  ;;  %v70_v0 = vld [vmem:[#allocation5 + $0x18] sm:$0xff]  ;;  %v69_v2 = vld [vmem:[#allocation5 + $0x10] sm:$0xff]  ;;  %vm78_vm0 = vcmask 261120   ;;  %s445_s15 = smov [#allocation8]  }
  0x27   :  { %v163_v1 = vld [vmem:[#allocation7 + $0x18] sm:$0xff]  ;;  %303 = vmatprep.subr.mxu0 %v70_v0  ;;  %v162_v3 = vld [vmem:[#allocation7 + $0x10] sm:$0xff]  ;;  %v68_v4 = vld [vmem:[#allocation5 + $0x8] sm:$0xff]  ;;  %s256_s16 = sshll.u32 %s445_s15, 4  ;;  %vm248_vm1 = vcmask 523264   ;;  %s446_s17 = smov [#allocation9]   ;;  %s257_s16 = int_to_ptr.vmem [resolvable:$true] %s256_s16 }
  0x28   :  { %314 = vmatprep.subr.mxu1 %v163_v1  ;;  %304 = vmatpush3.msra.mxu0 %v70_v0  ;;  %v161_v5 = vld [vmem:[#allocation7 + $0x8] sm:$0xff]  ;;  %v67_v6 = vld [vmem:[#allocation5] sm:$0xff]  ;;  %v65_v8 = vld [vmem:[#allocation2] sm:$0xff]  ;;  %s268_s18 = sshll.u32 %s446_s17, 4  ;;  %p397_p2 = scmp.lt.s32.totalorder %s257_s16, %s257_s16  ;;  %s269_s18 = int_to_ptr.vmem [resolvable:$true] %s268_s18 }
  0x29   :  { %315 = vmatpush3.msra.mxu1 %v163_v1  ;;  %305 = vmatprep.subr.mxu0 %v69_v2  ;;  %v160_v7 = vld [vmem:[#allocation7] sm:$0xff]  ;;  %v66_v9 = vld [vmem:[#allocation2 + $0x8] sm:$0xff]  ;;  %v285_v10 = vld [vmem:[%s527_s3] ss:$0 sm:$0xff]  ;;  %s392_s3 = scalar_lea.vmem %s257_s16, 256 }
  0x2a   :  { %316 = vmatprep.subr.mxu1 %v162_v3  ;;  %306 = vmatpush3.msra.mxu0 %v69_v2  ;;  %v288_v11 = vld [vmem:[%s528_s4] ss:$0 sm:$0xff]  ;;  %p393_p1 = scmp.ne.s32.totalorder %s257_s16, %s392_s3  ;;  %p398_p3 = scmp.lt.s32.totalorder %s392_s3, %s392_s3 }
  0x2b   :  { %317 = vmatpush3.msra.mxu1 %v162_v3  ;;  %307 = vmatprep.subr.mxu0 %v68_v4 }
  0x2c   :  { %318 = vmatprep.subr.mxu1 %v161_v5  ;;  %308 = vmatpush3.msra.mxu0 %v68_v4  ;;  %p399_p4 = por %p398_p3, %p397_p2 }
  0x2d   :  { %319 = vmatpush3.msra.mxu1 %v161_v5  ;;  %309 = vmatprep.subr.mxu0 %v67_v6 }
  0x2e   :  { %320 = vmatprep.subr.mxu1 %v160_v7  ;;  %310 = vmatpush3.msra.mxu0 %v67_v6  ;;  %p400_p5 = pnand %p399_p4, %p393_p1 }
  0x2f   :  { %311 = vmatprep.mubr.msk.f32.mxu0 %vm78_vm0, %v65_v8  ;;  %321 = vmatpush3.msra.mxu1 %v160_v7 }
  0x30   :  { %322 = vmatprep.mubr.msk.f32.mxu1 %vm78_vm0, %v65_v8  ;;  %312 = vmatmul.mubr.msk.f32.vlgmr.msra.gmra.mxu0 %vm78_vm0, %v66_v9 }
  0x31   :  { %323 = vmatmul.mubr.msk.f32.vlgmr.msra.gmra.mxu1 %vm78_vm0, %v66_v9 }
  0xf0   :  { %v313_v12 = vpop.f32.mrf.mxu0 }
  0xf1   :  { %v324_v13 = vpop.f32.mrf.mxu1  ;;  %v157_v14 = vadd.f32 %v313_v12, %v285_v10 }
  0xf2   :  { %v243_v15 = vadd.f32 %v324_v13, %v288_v11  ;;  %v151_v16 = vpop.f32.mrf.mxu0 }
  0xf3   :  { %v237_v17 = vpop.f32.mrf.mxu1  ;;  %247 = vst.msk [vmem:[#allocation8 + $0x8] sm:$0xff] %vm78_vm0, %v157_v14  ;;  %v152_v18 = vadd.f32 %v285_v10, %v151_v16 }
  0xf4   :  { %v238_v19 = vadd.f32 %v288_v11, %v237_v17  ;;  %250 = vst.msk [vmem:[#allocation9 + $0x8] sm:$0xff] %vm248_vm1, %v243_v15 }
  0xf5   :  { %246 = vst.msk [vmem:[#allocation8] sm:$0xff] %vm78_vm0, %v152_v18 }
  0xf6   :  { %249 = vst.msk [vmem:[#allocation9] sm:$0xff] %vm248_vm1, %v238_v19 }
  0xf7   :  { %403 = shalt.err (!%p400_p5)
}
  0xf8   :  { %262 = dma.vmem_to_hbm [thread:$0]  %s257_s16, 256, %s529_s5, [#allocation4], %s442_s26, %s442_s26, %s443_s27  }
  0xf9   :  { %s412_s20 = scalar_lea.vmem %s269_s18, 256  ;;  %p417_p7 = scmp.lt.s32.totalorder %s269_s18, %s269_s18 }
  0xfa   :  { %p413_p6 = scmp.ne.s32.totalorder %s269_s18, %s412_s20  ;;  %p418_p8 = scmp.lt.s32.totalorder %s412_s20, %s412_s20 }
  0xfc   :  { %p419_p9 = por %p418_p8, %p417_p7 }
  0xfe   :  { %p420_p10 = pnand %p419_p9, %p413_p6 }
 0x100   :  { %423 = shalt.err (!%p420_p10)
}
 0x101   :  { %274 = dma.vmem_to_hbm [thread:$0]  %s269_s18, 256, %s530_s6, [#allocation10], %s442_s26, %s442_s26, %s443_s27  }
 0x102   :  { %436 = dma.done.wait [#allocation4], 256  }
 0x103   :  { %437 = vsyncadd [#allocation4], 4294967040 }
 0x104   :  { %438 = dma.done.wait [#allocation10], 256  }
 0x105   :  { %439 = vsyncadd [#allocation10], 4294967040 }
 0x106   :  { %281 = vsyncpa [#allocation3], 1 }
 0x107   :  { %282 = vsyncpa [#allocation6], 1 }
 0x108   :  { %283 = vsyncpa [#allocation4], 1 }
 0x109   :  { %284 = vsyncpa [#allocation10], 1 }

</bundles_post_ra>
